<compile_context>
chip_gen: v7x
topology: tpu7x:2x2x1
jax: 0.10.0
libtpu: 0.0.40
codegen_flags: <defaults>
</compile_context>

<pallas_src>
import functools

import jax
import jax.numpy as jnp
from jax.experimental import pallas as pl
from jax.experimental.pallas import tpu as pltpu


def _ce_label_smooth_kernel(logits_ref, targets_ref, w_ref, out_ref, *,
                            n_rows: int, tile_n: int):
    """One batch tile: emit the (unnormalized) partial loss sum to SMEM."""
    x = logits_ref[...].astype(jnp.float32)              # (tile_n, C)
    tn, c = x.shape

    # Numerically stable log-softmax along the class axis (dim=1).
    m = jnp.max(x, axis=1, keepdims=True)
    z = x - m
    lse = jnp.log(jnp.sum(jnp.exp(z), axis=1, keepdims=True))
    log_probs = z - lse                                   # (tile_n, C)

    # Fused smoothed-target x class-weight coefficient (single select):
    #   coeff_c = w_ref[1, c] if c == target else w_ref[0, c]
    cls_idx = jax.lax.broadcasted_iota(jnp.int32, (tn, c), 1)
    tgt_mask = cls_idx == targets_ref[...]                # (tile_n, 1) broadcast
    coeff = jnp.where(tgt_mask, w_ref[1:2, :], w_ref[0:1, :])

    row_loss = -jnp.sum(log_probs * coeff, axis=1, keepdims=True)  # (tile_n, 1)

    # Mask padded rows of the last (partial) batch tile.
    row0 = pl.program_id(0) * tile_n
    row_idx = row0 + jax.lax.broadcasted_iota(jnp.int32, (tn, 1), 0)
    out_ref[0, 0] = jnp.sum(jnp.where(row_idx < n_rows, row_loss, 0.0))


def _pick_tile_n(n, c, itemsize, *, bytes_per_buffer=8 << 20, max_rows=2048):
    """Batch tile size: sized against a per-buffer VMEM budget (double-buffered
    by the pipeline), multiple of 8, or the full batch if it is small."""
    rows = max(8, bytes_per_buffer // max(1, c * itemsize))
    rows = min(rows, max_rows)
    rows = max(8, (rows // 8) * 8)
    return n if n <= rows else rows


def cross_entropy_label_smooth(logits, targets, frequence, *, epsilon,
                               weighted=True, tile_n=None):
    """logits: (N, C) float; targets: (N,) int; frequence: (C,) positive float."""
    n, c = logits.shape
    targets2d = targets.astype(jnp.int32).reshape(n, 1)

    frec = jnp.asarray(frequence, dtype=jnp.float32).reshape(1, c)
    if weighted:
        # Fold the /num_classes and /FREC divides into the resident coefficients.
        w = 1.0 / (float(c) * frec)
    else:
        w = jnp.ones((1, c), dtype=jnp.float32)
    eps = float(epsilon)
    # (2, C) resident table: off-target and on-target coefficients.
    w2 = jnp.concatenate([w * (eps / c), w * (eps / c + (1.0 - eps))], axis=0)

    itemsize = jnp.dtype(logits.dtype).itemsize
    if tile_n is None:
        tile_n = _pick_tile_n(n, c, itemsize)
    tile_n = int(min(tile_n, n))
    num_tiles = pl.cdiv(n, tile_n)

    kernel = functools.partial(
        _ce_label_smooth_kernel, n_rows=int(n), tile_n=int(tile_n))

    # Double-buffered logits + targets tiles, resident coefficient table,
    # headroom; capped at 48 MiB so it is safe on v7x's 64 MiB physical VMEM.
    vmem_needed = 2 * (tile_n * c * itemsize + tile_n * 4) + 2 * c * 4
    vmem_limit = int(min(max(2 * vmem_needed, 32 << 20), 48 << 20))

    cost = pl.CostEstimate(
        flops=6 * n * c,
        transcendentals=n * c + n,
        bytes_accessed=n * c * itemsize + n * 4 + 2 * c * 4 + num_tiles * 4,
    )

    partials = pl.pallas_call(
        kernel,
        out_shape=jax.ShapeDtypeStruct((num_tiles, 1), jnp.float32),
        grid=(num_tiles,),
        in_specs=[
            pl.BlockSpec((tile_n, c), lambda i: (i, 0)),   # logits tile
            pl.BlockSpec((tile_n, 1), lambda i: (i, 0)),   # targets tile
            pl.BlockSpec((2, c), lambda i: (0, 0)),        # resident coefficients
        ],
        # Per-tile scalar partial -> SMEM (avoids lane-sparse masked VMEM store).
        out_specs=pl.BlockSpec((1, 1), lambda i: (i, 0),
                               memory_space=pltpu.MemorySpace.SMEM),
        compiler_params=pltpu.CompilerParams(
            dimension_semantics=("parallel",),
            vmem_limit_bytes=vmem_limit,
        ),
        cost_estimate=cost,
    )(logits, targets2d, w2)

    # .mean(0).sum() == sum over everything / N; tiny final reduce in JAX.
    return jnp.sum(partials) / n


def _reference(logits, targets, frequence, *, epsilon, weighted=True):
    n, c = logits.shape
    x = logits.astype(jnp.float32)
    log_probs = jax.nn.log_softmax(x, axis=1)
    onehot = jax.nn.one_hot(targets, c, dtype=jnp.float32)
    t = (1.0 - epsilon) * onehot + epsilon / c
    frec = jnp.asarray(frequence, jnp.float32)[None, :]
    if weighted:
        contrib = -t * log_probs / c / frec
    else:
        contrib = -(t * log_probs)
    return contrib.mean(0).sum()


if __name__ == "__main__":
    key = jax.random.PRNGKey(0)
    k_logits, k_targets, k_frec = jax.random.split(key, 3)

    N, C = 8, 16          # small batch, num_classes
    epsilon = 0.1

    logits = jax.random.normal(k_logits, (N, C), dtype=jnp.float32)
    targets = jax.random.randint(k_targets, (N,), 0, C, dtype=jnp.int32)
    # deterministic positive class frequencies (the `frequence` arg of __init__)
    frequence = jax.random.uniform(k_frec, (C,), dtype=jnp.float32,
                                   minval=0.1, maxval=1.0)

    # weighted branch
    loss = cross_entropy_label_smooth(logits, targets, frequence,
                                      epsilon=epsilon, weighted=True)
    loss = jax.block_until_ready(loss)
    ref = _reference(logits, targets, frequence, epsilon=epsilon, weighted=True)
    assert jnp.allclose(loss, ref, rtol=1e-5, atol=1e-5), (loss, ref)

    # unweighted branch
    loss_uw = cross_entropy_label_smooth(logits, targets, frequence,
                                         epsilon=epsilon, weighted=False)
    loss_uw = jax.block_until_ready(loss_uw)
    ref_uw = _reference(logits, targets, frequence, epsilon=epsilon,
                        weighted=False)
    assert jnp.allclose(loss_uw, ref_uw, rtol=1e-5, atol=1e-5), (loss_uw, ref_uw)

    # multi-tile path with a padded last tile (N=24 rows, forced tile of 16)
    N2 = 24
    k_l2, k_t2 = jax.random.split(jax.random.PRNGKey(1), 2)
    logits2 = jax.random.normal(k_l2, (N2, C), dtype=jnp.float32)
    targets2 = jax.random.randint(k_t2, (N2,), 0, C, dtype=jnp.int32)
    loss2 = cross_entropy_label_smooth(logits2, targets2, frequence,
                                       epsilon=epsilon, weighted=True,
                                       tile_n=16)
    loss2 = jax.block_until_ready(loss2)
    ref2 = _reference(logits2, targets2, frequence, epsilon=epsilon,
                      weighted=True)
    assert jnp.allclose(loss2, ref2, rtol=1e-5, atol=1e-5), (loss2, ref2)

    print("KERNEL_OK")
</pallas_src>

<mosaic_0001>
module attributes {stable_mosaic.version = 11 : i64} {
  func.func @_ce_label_smooth_kernel(%arg0: i32, %arg1: memref<8x16xf32, #tpu.memory_space<vmem>>, %arg2: memref<8x1xi32, #tpu.memory_space<vmem>>, %arg3: memref<2x16xf32, #tpu.memory_space<vmem>>, %arg4: memref<1x1xf32, #tpu.memory_space<smem>>) attributes {dimension_semantics = [#tpu.dimension_semantics<parallel>], iteration_bounds = array<i64: 1>, scalar_prefetch = 0 : i64, scratch_operands = 0 : i64, tpu.core_type = #tpu.core_type<tc>, window_params = [{transform_indices = @transform_0, window_bounds = array<i64: 8, 16>}, {transform_indices = @transform_1, window_bounds = array<i64: 8, 1>}, {pipeline_mode = #tpu.pipeline_mode<synchronous>, transform_indices = @transform_2, window_bounds = array<i64: 2, 16>}, {transform_indices = @transform_3, window_bounds = array<i64: 1, 1>}]} {
    %c0 = arith.constant 0 : index
    %c0_0 = arith.constant 0 : index
    %0 = vector.load %arg1[%c0, %c0_0] : memref<8x16xf32, #tpu.memory_space<vmem>>, vector<8x16xf32>
    %cst = arith.constant dense<0xFF800000> : vector<8xf32>
    %1 = vector.multi_reduction <maximumf>, %0, %cst [1] : vector<8x16xf32> to vector<8xf32>
    %2 = vector.shape_cast %1 : vector<8xf32> to vector<8x1xf32>
    %3 = vector.broadcast %2 : vector<8x1xf32> to vector<8x16xf32>
    %4 = arith.subf %0, %3 : vector<8x16xf32>
    %5 = math.exp %4 : vector<8x16xf32>
    %cst_1 = arith.constant dense<0.000000e+00> : vector<8xf32>
    %6 = vector.multi_reduction <add>, %5, %cst_1 [1] : vector<8x16xf32> to vector<8xf32>
    %7 = vector.shape_cast %6 : vector<8xf32> to vector<8x1xf32>
    %8 = math.log %7 : vector<8x1xf32>
    %9 = vector.broadcast %8 : vector<8x1xf32> to vector<8x16xf32>
    %10 = arith.subf %4, %9 : vector<8x16xf32>
    %11 = tpu.iota {dimensions = array<i32: 1>} : vector<8x16xi32>
    %c0_2 = arith.constant 0 : index
    %c0_3 = arith.constant 0 : index
    %12 = vector.load %arg2[%c0_2, %c0_3] : memref<8x1xi32, #tpu.memory_space<vmem>>, vector<8x1xi32>
    %13 = vector.broadcast %12 : vector<8x1xi32> to vector<8x16xi32>
    %14 = arith.cmpi eq, %11, %13 : vector<8x16xi32>
    %c1 = arith.constant 1 : index
    %c0_4 = arith.constant 0 : index
    %15 = vector.load %arg3[%c1, %c0_4] : memref<2x16xf32, #tpu.memory_space<vmem>>, vector<1x16xf32>
    %c0_5 = arith.constant 0 : index
    %c0_6 = arith.constant 0 : index
    %16 = vector.load %arg3[%c0_5, %c0_6] : memref<2x16xf32, #tpu.memory_space<vmem>>, vector<1x16xf32>
    %17 = vector.shape_cast %15 : vector<1x16xf32> to vector<1x16xf32>
    %18 = vector.broadcast %17 : vector<1x16xf32> to vector<8x16xf32>
    %19 = vector.shape_cast %16 : vector<1x16xf32> to vector<1x16xf32>
    %20 = vector.broadcast %19 : vector<1x16xf32> to vector<8x16xf32>
    %21 = arith.select %14, %18, %20 : vector<8x16xi1>, vector<8x16xf32>
    %22 = arith.mulf %10, %21 : vector<8x16xf32>
    %cst_7 = arith.constant dense<0.000000e+00> : vector<8xf32>
    %23 = vector.multi_reduction <add>, %22, %cst_7 [1] : vector<8x16xf32> to vector<8xf32>
    %24 = vector.shape_cast %23 : vector<8xf32> to vector<8x1xf32>
    %cst_8 = arith.constant 0.000000e+00 : f32
    %25 = vector.broadcast %cst_8 : f32 to vector<8x1xf32>
    %26 = arith.subf %25, %24 : vector<8x1xf32>
    %c8_i32 = arith.constant 8 : i32
    %27 = arith.muli %arg0, %c8_i32 : i32
    %28 = tpu.iota {dimensions = array<i32: 0>} : vector<8x1xi32>
    %29 = vector.broadcast %27 : i32 to vector<8x1xi32>
    %30 = arith.addi %29, %28 : vector<8x1xi32>
    %c8_i32_9 = arith.constant 8 : i32
    %31 = vector.broadcast %c8_i32_9 : i32 to vector<8x1xi32>
    %32 = arith.cmpi slt, %30, %31 : vector<8x1xi32>
    %cst_10 = arith.constant 0.000000e+00 : f32
    %33 = vector.broadcast %cst_10 : f32 to vector<8x1xf32>
    %34 = arith.select %32, %26, %33 : vector<8x1xi1>, vector<8x1xf32>
    %35 = vector.shape_cast %34 : vector<8x1xf32> to vector<1x8x1xf32>
    %cst_11 = arith.constant dense<0.000000e+00> : vector<1xf32>
    %36 = vector.multi_reduction <add>, %35, %cst_11 [1, 2] : vector<1x8x1xf32> to vector<1xf32>
    %37 = vector.shape_cast %36 : vector<1xf32> to vector<1x1x1xf32>
    %38 = vector.extract %37[0, 0, 0] : f32 from vector<1x1x1xf32>
    %c0_12 = arith.constant 0 : index
    %c0_13 = arith.constant 0 : index
    %39 = memref.load %arg4[%c0_12, %c0_13] : memref<1x1xf32, #tpu.memory_space<smem>>
    memref.store %38, %arg4[%c0_12, %c0_13] : memref<1x1xf32, #tpu.memory_space<smem>>
    return
  }
  func.func @transform_0(%arg0: i32) -> (i32, i32) {
    %c0_i32 = arith.constant 0 : i32
    %c0_i32_0 = arith.constant 0 : i32
    return %arg0, %c0_i32 : i32, i32
  }
  func.func @transform_1(%arg0: i32) -> (i32, i32) {
    %c0_i32 = arith.constant 0 : i32
    %c0_i32_0 = arith.constant 0 : i32
    return %arg0, %c0_i32 : i32, i32
  }
  func.func @transform_2(%arg0: i32) -> (i32, i32) {
    %c0_i32 = arith.constant 0 : i32
    %c0_i32_0 = arith.constant 0 : i32
    %c0_i32_1 = arith.constant 0 : i32
    return %c0_i32, %c0_i32_0 : i32, i32
  }
  func.func @transform_3(%arg0: i32) -> (i32, i32) {
    %c0_i32 = arith.constant 0 : i32
    %c0_i32_0 = arith.constant 0 : i32
    return %arg0, %c0_i32 : i32, i32
  }
}

</mosaic_0001>

<bundles_post_ra>
// kernel: tpu_custom_call.1
= control target key start
LH: loop header
LB: loop body
LE: loop exit
PB: predicated region body
PF: predicated region fallthrough
CT: control target
= control target key end

     0   :  { %vm16_vm0 = vcmask 130048   ;;  %s158_s0 = inlined_call_operand.vmem [shape: f32[8,16], index: 0, kind: input, shape index: {}]   ;;  %s159_s1 = inlined_call_operand.vmem [shape: s32[8,1], index: 1, kind: input, shape index: {}]   ;;  %s160_s2 = inlined_call_operand.vmem [shape: f32[2,16], index: 2, kind: input, shape index: {}]   ;;  %s161_s3 = inlined_call_operand.hbm [shape: f32[1,1], index: 3, kind: output, shape index: {}]  }
   0x1   :  { %v15_v0 = vld [vmem:[%s158_s0] sm:$0xff] }
   0x2   :  { %8 = vsyncpa [#allocation3], 0  ;;  %v17_v1 = vsel %vm16_vm0, %v15_v0, -inf  ;;  %v31_v2 = vld [vmem:[%s159_s1] sm:$0xff]  ;;  %v109_v3 = vmov 0   ;;  %v29_v10 = vlaneseq  ;;  %vm59_vm2 = vcmask 7168  }
   0x3   :  { %18 = vmax.xlane.f32.xlu0 %v17_v1  ;;  %91 = vset.pattern.permute.xlu1 %v109_v3  ;;  %v85_v13 = vld [vmem:[%s160_s2 + $0x1] ss:$0 sm:$0xff]  ;;  %v86_v14 = vld [vmem:[%s160_s2] ss:$0 sm:$0xff]  ;;  %s97_s20 = scalar_lea.hbm %s161_s3, 16 }
   0x4   :  { %92 = vset.pattern.permute.xlu0 %v109_v3  ;;  %33 = vperm.xlu1 %91, %v31_v2   ;;  %v30_v11 = vand.u32 127, %v29_v10  ;;  %p98_p0 = scmp.ne.s32.totalorder %s161_s3, %s97_s20  ;;  %p101_p1 = scmp.lt.u32.totalorder %s97_s20, %s161_s3 }
   0x6   :  { %p103_p2 = pnand %p101_p1, %p98_p0 }
  0x83   :  { %v34_v12 = vpop.permute.xlu1 %33 }
  0x84   :  { %vm35_vm1 = vcmp.eq.s32.totalorder %v30_v11, %v34_v12 }
  0x85   :  { %v46_v17 = vsel %vm35_vm1, %v85_v13, %v86_v14 }
  0x90   :  { %v19_v4 = vpop.xlane.xlu0 %18 }
  0x91   :  { %v20_v5 = vsub.f32 %v15_v0, %v19_v4 }
  0x93   :  { %v21_v6 = vmul.f32 1.442695, %v20_v5 }
  0x95   :  { %93 = vpow2.f32 %v21_v6 }
  0x9f   :  { %v94_v7 = vpop.eup %93 }
  0xa0   :  { %v23_v8 = vsel %vm16_vm0, %v94_v7, 0.0 }
  0xa1   :  { %24 = vadd.xlane.f32.xlu0 %v23_v8 }
 0x12e   :  { %v25_v9 = vpop.xlane.xlu0 %24 }
 0x12f   :  { %95 = vlog2.f32 %v25_v9 }
 0x139   :  { %v96_v15 = vpop.eup %95 }
 0x13a   :  { %v27_v16 = vmul.f32 0.6931472, %v96_v15 }
 0x13c   :  { %v28_v18 = vsub.f32 %v20_v5, %v27_v16 }
 0x13e   :  { %v47_v19 = vmul.f32 %v46_v17, %v28_v18 }
 0x140   :  { %v48_v20 = vsel %vm16_vm0, %v47_v19, 0.0 }
 0x141   :  { %49 = vadd.xlane.f32.xlu1 %v48_v20 }
 0x1ce   :  { %v50_v21 = vpop.xlane.xlu1 %49 }
 0x1cf   :  { %v51_v22 = vsub.f32 0.0, %v50_v21 }
 0x1d1   :  { %v60_v23 = vsel %vm59_vm2, %v51_v22, 0.0 }
 0x1d2   :  { %61 = vadd.xlane.f32.xlu0 %v60_v23 }
 0x25f   :  { %v62_v24 = vpop.xlane.xlu0 %61 }
 0x260   :  { %v63_v25 = vrot.slane %v62_v24, 4 }
 0x262   :  { %v64_v26 = vadd.f32 %v63_v25, %v62_v24 }
 0x264   :  { %v65_v27 = vrot.slane %v64_v26, 2 }
 0x266   :  { %v66_v28 = vadd.f32 %v65_v27, %v64_v26 }
 0x268   :  { %v67_v29 = vrot.slane %v66_v28, 1 }
 0x26a   :  { %v68_v30 = vadd.f32 %v67_v29, %v66_v28 }
 0x26c   :  { %87 = vpush %v68_v30 }
 0x29d   :  { %s88_s2 = spop %87 }
 0x29e   :  { %71 = sst [smem:[#allocation2]] %s88_s2 }
 0x29f   :  { %106 = shalt.err (!%p103_p2)
}
 0x2a0   :  { %s110_s25 = smov [#allocation2]  }
 0x2a1   :  { %79 = dma.smem_to_hbm %s110_s25, 16, %s161_s3, [#allocation3]  }
 0x2a2   :  { %107 = dma.done.wait [#allocation3], 16  }
 0x2a3   :  { %108 = vsyncadd [#allocation3], 4294967280 }
 0x2a4   :  { %83 = sfence }
 0x2a5   :  { %84 = vsyncpa [#allocation3], 1 }

</bundles_post_ra>
